<compile_context>
chip_gen: v7x
topology: tpu7x:2x2x1
jax: 0.10.0
libtpu: 0.0.40
codegen_flags: <defaults>
</compile_context>

<pallas_src>
import functools

import jax
import jax.numpy as jnp
from jax.experimental import pallas as pl
from jax.experimental.pallas import tpu as pltpu

EMBEDDING_SIZE = 128
BLOCK_SIZE = 256  # max context (only needs T <= BLOCK_SIZE)
DROPOUT = 0.3     # unused at inference


def _mha_kernel(x_ref, wqkv_ref, wp_ref, bp_ref, o_ref, *, num_heads, head_size):
    """One grid step = Bb batch elements.

    x_ref    : (Bb, T, C)       bf16 batch block
    wqkv_ref : (C, 3*H*Hs)      bf16 fused [q | k | v] projection (q part pre-scaled)
    wp_ref   : (H*Hs, C)        bf16 output projection weight
    bp_ref   : (1, C)           f32 output projection bias
    o_ref    : (Bb, T, C)       f32 output
    """
    Bb, T, C = x_ref.shape
    hhs = num_heads * head_size

    # ---- Fused QKV projection: one (Bb*T, C) @ (C, 3*H*Hs) MXU matmul ----
    x2d = x_ref[...].reshape(Bb * T, C)                            # bf16
    qkv = jnp.dot(x2d, wqkv_ref[...], preferred_element_type=jnp.float32)
    qkv = qkv.astype(jnp.bfloat16).reshape(Bb, T, 3 * hhs)         # cast to bf16 once

    # Causal (lower-triangular) mask, built with 2-D iota (TPU needs >=2D iota),
    # broadcast over the batch-block axis.
    rows = jax.lax.broadcasted_iota(jnp.int32, (T, T), 0)
    cols = jax.lax.broadcasted_iota(jnp.int32, (T, T), 1)
    causal = (cols <= rows)[None, :, :]                            # (1, T, T)

    # Lane-dense f32 accumulator for the output projection (C = 128 lanes).
    out_acc = jnp.zeros((Bb * T, C), jnp.float32)

    for h in range(num_heads):        # H is static -> unrolled; heads are independent
        lo = h * head_size
        hi = lo + head_size
        q = qkv[:, :, lo:hi]                           # (Bb, T, Hs), pre-scaled by Hs**-0.5
        k = qkv[:, :, hhs + lo:hhs + hi]               # (Bb, T, Hs)
        v = qkv[:, :, 2 * hhs + lo:2 * hhs + hi]       # (Bb, T, Hs)

        # Scores: batched over Bb, contract head dim directly (no materialized k.T).
        s = jnp.einsum('bqd,bkd->bqk', q, k,
                       preferred_element_type=jnp.float32)         # (Bb, T, T) f32
        s = jnp.where(causal, s, -1e30)          # large finite negative: robust vs -inf
        m = jnp.max(s, axis=-1, keepdims=True)
        p = jnp.exp(s - m)
        denom = jnp.sum(p, axis=-1, keepdims=True)                 # (Bb, T, 1)
        p = p * pl.reciprocal(denom, approx=True)                  # EUP recip, VALU mul

        head_out = jnp.einsum('bqk,bkd->bqd', p.astype(jnp.bfloat16), v,
                              preferred_element_type=jnp.float32)  # (Bb, T, Hs) f32

        # Accumulate output projection per head: (Bb*T, Hs) @ (Hs, C) -> (Bb*T, C).
        out_acc = out_acc + jnp.dot(
            head_out.reshape(Bb * T, head_size).astype(jnp.bfloat16),
            wp_ref[lo:hi, :], preferred_element_type=jnp.float32)

    out = out_acc + bp_ref[0]
    o_ref[...] = out.reshape(Bb, T, C).astype(o_ref.dtype)


def _largest_divisor_leq(n, cap):
    cap = max(1, min(n, cap))
    for d in range(cap, 0, -1):
        if n % d == 0:
            return d
    return 1


@jax.jit
def multi_head_attention(x, wq, wk, wv, wp, bp):
    B, T, C = x.shape
    H, _, Hs = wq.shape
    hhs = H * Hs
    scale = Hs ** -0.5

    # Fuse per-head weights into one (C, 3*H*Hs) matrix; fold the 1/sqrt(Hs) scale
    # into the q-projection (free). Cast everything feeding matmuls to bf16.
    wq_f = jnp.transpose(wq, (1, 0, 2)).reshape(C, hhs) * scale
    wk_f = jnp.transpose(wk, (1, 0, 2)).reshape(C, hhs)
    wv_f = jnp.transpose(wv, (1, 0, 2)).reshape(C, hhs)
    w_qkv = jnp.concatenate([wq_f, wk_f, wv_f], axis=1).astype(jnp.bfloat16)

    x_bf = x.astype(jnp.bfloat16)
    wp_bf = wp.astype(jnp.bfloat16)
    bp2 = bp.reshape(1, C).astype(jnp.float32)

    # Batch-blocking: as many batch elements per grid step as comfortably fit
    # (Bb*T capped so the (Bb,T,T) score + qkv intermediates stay well under VMEM).
    bb = _largest_divisor_leq(B, max(1, 2048 // max(T, 1)))
    grid = (B // bb,)

    # Explicit VMEM budget derived from the per-step footprint (double-buffered I/O
    # + intermediates), capped at 64 MiB (v7x physical ceiling).
    per_step = (
        2 * (bb * T * C * 2)                            # x block, bf16, double-buffered
        + 2 * (bb * T * C * 4)                          # out block, f32, double-buffered
        + 2 * (C * 3 * hhs * 2 + hhs * C * 2 + C * 4)   # weights + bias
        + bb * T * 3 * hhs * (4 + 2)                    # qkv f32 + bf16 copy
        + 2 * (bb * T * T * 4)                          # live score tile (+ headroom)
        + bb * T * C * 4                                # output-projection accumulator
    )
    vmem_limit = int(min(64 * 1024 * 1024, max(32 * 1024 * 1024, 2 * per_step)))

    # Advisory cost estimate for the XLA scheduler.
    flops = B * (
        2 * T * C * (3 * hhs)          # fused QKV projection
        + H * (4 * T * T * Hs)         # q@k^T and p@v per head
        + 2 * T * hhs * C              # output projection
    )
    bytes_accessed = (
        B * T * C * 2                  # x (bf16 in)
        + C * 3 * hhs * 2              # fused qkv weight
        + hhs * C * 2                  # output proj weight
        + C * 4                        # bias
        + B * T * C * 4                # f32 output
    )
    cost = pl.CostEstimate(flops=flops, transcendentals=B * H * T * T,
                           bytes_accessed=bytes_accessed)

    kernel = functools.partial(_mha_kernel, num_heads=H, head_size=Hs)

    return pl.pallas_call(
        kernel,
        out_shape=jax.ShapeDtypeStruct((B, T, C), jnp.float32),
        grid=grid,
        in_specs=[
            pl.BlockSpec((bb, T, C), lambda b: (b, 0, 0)),
            pl.BlockSpec((C, 3 * hhs), lambda b: (0, 0)),
            pl.BlockSpec((hhs, C), lambda b: (0, 0)),
            pl.BlockSpec((1, C), lambda b: (0, 0)),
        ],
        out_specs=pl.BlockSpec((bb, T, C), lambda b: (b, 0, 0)),
        compiler_params=pltpu.CompilerParams(
            dimension_semantics=("parallel",),
            vmem_limit_bytes=vmem_limit),
        cost_estimate=cost,
    )(x_bf, w_qkv, wp_bf, bp2)


def reference(x, wq, wk, wv, wp, bp):
    """Plain-JAX f32 reference replicating the PyTorch forward (eval mode)."""
    B, T, C = x.shape
    H, _, Hs = wq.shape
    mask = jnp.tril(jnp.ones((T, T), dtype=bool))
    outs = []
    for h in range(H):
        q = x @ wq[h]                       # (B, T, Hs)
        k = x @ wk[h]
        v = x @ wv[h]
        wei = (q @ jnp.swapaxes(k, -2, -1)) * (Hs ** -0.5)
        wei = jnp.where(mask, wei, -jnp.inf)
        wei = jax.nn.softmax(wei, axis=-1)
        outs.append(wei @ v)
    cat = jnp.concatenate(outs, axis=-1)    # (B, T, H*Hs)
    return cat @ wp + bp


if __name__ == "__main__":
    B, T = 2, 8
    H, Hs = 4, 32                 # num_heads * head_size == EMBEDDING_SIZE
    C = EMBEDDING_SIZE

    key = jax.random.PRNGKey(0)
    kx, kq, kk, kv, kp, kb = jax.random.split(key, 6)

    x = jax.random.normal(kx, (B, T, C), dtype=jnp.float32)
    wq = jax.random.normal(kq, (H, C, Hs), dtype=jnp.float32) * (C ** -0.5)
    wk = jax.random.normal(kk, (H, C, Hs), dtype=jnp.float32) * (C ** -0.5)
    wv = jax.random.normal(kv, (H, C, Hs), dtype=jnp.float32) * (C ** -0.5)
    wp = jax.random.normal(kp, (H * Hs, C), dtype=jnp.float32) * ((H * Hs) ** -0.5)
    bp = jax.random.normal(kb, (C,), dtype=jnp.float32) * 0.01

    out = multi_head_attention(x, wq, wk, wv, wp, bp)
    out = jax.block_until_ready(out)

    ref = reference(x, wq, wk, wv, wp, bp)
    assert out.shape == (B, T, C)
    # Kernel runs its matmuls with bf16 inputs (f32 accumulate); tolerance vs the
    # pure-f32 reference is loosened accordingly. Structural bugs (mask / head order /
    # projection) would produce O(1) errors and still fail this check.
    assert jnp.allclose(out, ref, atol=1e-1, rtol=1e-1), "mismatch vs reference"

    print("KERNEL_OK")
</pallas_src>

<mosaic_0001>
module attributes {stable_mosaic.version = 11 : i64} {
  func.func @_mha_kernel(%arg0: i32, %arg1: memref<2x8x128xbf16, #tpu.memory_space<vmem>>, %arg2: memref<128x384xbf16, #tpu.memory_space<vmem>>, %arg3: memref<128x128xbf16, #tpu.memory_space<vmem>>, %arg4: memref<1x128xf32, #tpu.memory_space<vmem>>, %arg5: memref<2x8x128xf32, #tpu.memory_space<vmem>>) attributes {dimension_semantics = [#tpu.dimension_semantics<parallel>], iteration_bounds = array<i64: 1>, scalar_prefetch = 0 : i64, scratch_operands = 0 : i64, tpu.core_type = #tpu.core_type<tc>, window_params = [{transform_indices = @transform_0, window_bounds = array<i64: 2, 8, 128>}, {pipeline_mode = #tpu.pipeline_mode<synchronous>, transform_indices = @transform_1, window_bounds = array<i64: 128, 384>}, {pipeline_mode = #tpu.pipeline_mode<synchronous>, transform_indices = @transform_2, window_bounds = array<i64: 128, 128>}, {pipeline_mode = #tpu.pipeline_mode<synchronous>, transform_indices = @transform_3, window_bounds = array<i64: 1, 128>}, {transform_indices = @transform_4, window_bounds = array<i64: 2, 8, 128>}]} {
    %c0 = arith.constant 0 : index
    %c0_0 = arith.constant 0 : index
    %c0_1 = arith.constant 0 : index
    %0 = vector.load %arg1[%c0, %c0_0, %c0_1] : memref<2x8x128xbf16, #tpu.memory_space<vmem>>, vector<2x8x128xbf16>
    %1 = vector.shape_cast %0 : vector<2x8x128xbf16> to vector<16x128xbf16>
    %c0_2 = arith.constant 0 : index
    %c0_3 = arith.constant 0 : index
    %2 = vector.load %arg2[%c0_2, %c0_3] : memref<128x384xbf16, #tpu.memory_space<vmem>>, vector<128x384xbf16>
    %cst = arith.constant dense<0.000000e+00> : vector<16x384xf32>
    %3 = tpu.matmul %1, %2, %cst {dimension_numbers = #tpu.dot_dimension_numbers<[1], [0], [0], [1], [0, 0, 1, 1], [], []>} : vector<16x128xbf16>, vector<128x384xbf16>, vector<16x384xf32> -> vector<16x384xf32>
    %4 = arith.truncf %3 : vector<16x384xf32> to vector<16x384xbf16>
    %5 = vector.shape_cast %4 : vector<16x384xbf16> to vector<2x8x384xbf16>
    %6 = tpu.iota {dimensions = array<i32: 0>} : vector<8x8xi32>
    %7 = tpu.iota {dimensions = array<i32: 1>} : vector<8x8xi32>
    %8 = arith.cmpi sle, %7, %6 : vector<8x8xi32>
    %9 = vector.shape_cast %8 : vector<8x8xi1> to vector<1x8x8xi1>
    %cst_4 = arith.constant 0.000000e+00 : f32
    %10 = vector.broadcast %cst_4 : f32 to vector<16x128xf32>
    %11 = vector.extract_strided_slice %5 {offsets = [0, 0, 0], sizes = [2, 8, 32], strides = [1, 1, 1]} : vector<2x8x384xbf16> to vector<2x8x32xbf16>
    %12 = vector.extract_strided_slice %5 {offsets = [0, 0, 128], sizes = [2, 8, 32], strides = [1, 1, 1]} : vector<2x8x384xbf16> to vector<2x8x32xbf16>
    %13 = vector.extract_strided_slice %5 {offsets = [0, 0, 256], sizes = [2, 8, 32], strides = [1, 1, 1]} : vector<2x8x384xbf16> to vector<2x8x32xbf16>
    "tpu.trace_start"() <{level = 10 : i32, message = "bqd,bkd->bqk"}> : () -> ()
    %cst_5 = arith.constant dense<0.000000e+00> : vector<2x8x8xf32>
    %14 = tpu.matmul %11, %12, %cst_5 {dimension_numbers = #tpu.dot_dimension_numbers<[2], [2], [1], [1], [0, 0, 0, 1, 1, 1], [0], [0]>} : vector<2x8x32xbf16>, vector<2x8x32xbf16>, vector<2x8x8xf32> -> vector<2x8x8xf32>
    %cst_6 = arith.constant -1.000000e+30 : f32
    "tpu.trace_stop"() : () -> ()
    %15 = vector.shape_cast %9 : vector<1x8x8xi1> to vector<1x8x8xi1>
    %16 = vector.broadcast %15 : vector<1x8x8xi1> to vector<2x8x8xi1>
    %17 = vector.broadcast %cst_6 : f32 to vector<2x8x8xf32>
    %18 = arith.select %16, %14, %17 : vector<2x8x8xi1>, vector<2x8x8xf32>
    %cst_7 = arith.constant dense<0xFF800000> : vector<2x8xf32>
    %19 = vector.multi_reduction <maximumf>, %18, %cst_7 [2] : vector<2x8x8xf32> to vector<2x8xf32>
    %20 = vector.shape_cast %19 : vector<2x8xf32> to vector<2x8x1xf32>
    %21 = vector.broadcast %20 : vector<2x8x1xf32> to vector<2x8x8xf32>
    %22 = arith.subf %18, %21 : vector<2x8x8xf32>
    %23 = math.exp %22 : vector<2x8x8xf32>
    %cst_8 = arith.constant dense<0.000000e+00> : vector<2x8xf32>
    %24 = vector.multi_reduction <add>, %23, %cst_8 [2] : vector<2x8x8xf32> to vector<2x8xf32>
    %25 = vector.shape_cast %24 : vector<2x8xf32> to vector<2x8x1xf32>
    %26 = tpu.reciprocal %25 {approx = true} : vector<2x8x1xf32> -> vector<2x8x1xf32>
    %27 = vector.broadcast %26 : vector<2x8x1xf32> to vector<2x8x8xf32>
    %28 = arith.mulf %23, %27 : vector<2x8x8xf32>
    %29 = arith.truncf %28 : vector<2x8x8xf32> to vector<2x8x8xbf16>
    "tpu.trace_start"() <{level = 10 : i32, message = "bqk,bkd->bqd"}> : () -> ()
    %cst_9 = arith.constant dense<0.000000e+00> : vector<2x8x32xf32>
    %30 = tpu.matmul %29, %13, %cst_9 {dimension_numbers = #tpu.dot_dimension_numbers<[2], [1], [1], [2], [0, 0, 0, 1, 1, 2], [0], [0]>} : vector<2x8x8xbf16>, vector<2x8x32xbf16>, vector<2x8x32xf32> -> vector<2x8x32xf32>
    "tpu.trace_stop"() : () -> ()
    %31 = vector.shape_cast %30 : vector<2x8x32xf32> to vector<16x32xf32>
    %32 = arith.truncf %31 : vector<16x32xf32> to vector<16x32xbf16>
    %c0_10 = arith.constant 0 : index
    %c0_11 = arith.constant 0 : index
    %33 = vector.load %arg3[%c0_10, %c0_11] : memref<128x128xbf16, #tpu.memory_space<vmem>>, vector<32x128xbf16>
    %cst_12 = arith.constant dense<0.000000e+00> : vector<16x128xf32>
    %34 = tpu.matmul %32, %33, %cst_12 {dimension_numbers = #tpu.dot_dimension_numbers<[1], [0], [0], [1], [0, 0, 1, 1], [], []>} : vector<16x32xbf16>, vector<32x128xbf16>, vector<16x128xf32> -> vector<16x128xf32>
    %35 = arith.addf %10, %34 : vector<16x128xf32>
    %36 = vector.extract_strided_slice %5 {offsets = [0, 0, 32], sizes = [2, 8, 32], strides = [1, 1, 1]} : vector<2x8x384xbf16> to vector<2x8x32xbf16>
    %37 = vector.extract_strided_slice %5 {offsets = [0, 0, 160], sizes = [2, 8, 32], strides = [1, 1, 1]} : vector<2x8x384xbf16> to vector<2x8x32xbf16>
    %38 = vector.extract_strided_slice %5 {offsets = [0, 0, 288], sizes = [2, 8, 32], strides = [1, 1, 1]} : vector<2x8x384xbf16> to vector<2x8x32xbf16>
    "tpu.trace_start"() <{level = 10 : i32, message = "bqd,bkd->bqk"}> : () -> ()
    %cst_13 = arith.constant dense<0.000000e+00> : vector<2x8x8xf32>
    %39 = tpu.matmul %36, %37, %cst_13 {dimension_numbers = #tpu.dot_dimension_numbers<[2], [2], [1], [1], [0, 0, 0, 1, 1, 1], [0], [0]>} : vector<2x8x32xbf16>, vector<2x8x32xbf16>, vector<2x8x8xf32> -> vector<2x8x8xf32>
    %cst_14 = arith.constant -1.000000e+30 : f32
    "tpu.trace_stop"() : () -> ()
    %40 = vector.shape_cast %9 : vector<1x8x8xi1> to vector<1x8x8xi1>
    %41 = vector.broadcast %40 : vector<1x8x8xi1> to vector<2x8x8xi1>
    %42 = vector.broadcast %cst_14 : f32 to vector<2x8x8xf32>
    %43 = arith.select %41, %39, %42 : vector<2x8x8xi1>, vector<2x8x8xf32>
    %cst_15 = arith.constant dense<0xFF800000> : vector<2x8xf32>
    %44 = vector.multi_reduction <maximumf>, %43, %cst_15 [2] : vector<2x8x8xf32> to vector<2x8xf32>
    %45 = vector.shape_cast %44 : vector<2x8xf32> to vector<2x8x1xf32>
    %46 = vector.broadcast %45 : vector<2x8x1xf32> to vector<2x8x8xf32>
    %47 = arith.subf %43, %46 : vector<2x8x8xf32>
    %48 = math.exp %47 : vector<2x8x8xf32>
    %cst_16 = arith.constant dense<0.000000e+00> : vector<2x8xf32>
    %49 = vector.multi_reduction <add>, %48, %cst_16 [2] : vector<2x8x8xf32> to vector<2x8xf32>
    %50 = vector.shape_cast %49 : vector<2x8xf32> to vector<2x8x1xf32>
    %51 = tpu.reciprocal %50 {approx = true} : vector<2x8x1xf32> -> vector<2x8x1xf32>
    %52 = vector.broadcast %51 : vector<2x8x1xf32> to vector<2x8x8xf32>
    %53 = arith.mulf %48, %52 : vector<2x8x8xf32>
    %54 = arith.truncf %53 : vector<2x8x8xf32> to vector<2x8x8xbf16>
    "tpu.trace_start"() <{level = 10 : i32, message = "bqk,bkd->bqd"}> : () -> ()
    %cst_17 = arith.constant dense<0.000000e+00> : vector<2x8x32xf32>
    %55 = tpu.matmul %54, %38, %cst_17 {dimension_numbers = #tpu.dot_dimension_numbers<[2], [1], [1], [2], [0, 0, 0, 1, 1, 2], [0], [0]>} : vector<2x8x8xbf16>, vector<2x8x32xbf16>, vector<2x8x32xf32> -> vector<2x8x32xf32>
    "tpu.trace_stop"() : () -> ()
    %56 = vector.shape_cast %55 : vector<2x8x32xf32> to vector<16x32xf32>
    %57 = arith.truncf %56 : vector<16x32xf32> to vector<16x32xbf16>
    %c32 = arith.constant 32 : index
    %c0_18 = arith.constant 0 : index
    %58 = vector.load %arg3[%c32, %c0_18] : memref<128x128xbf16, #tpu.memory_space<vmem>>, vector<32x128xbf16>
    %cst_19 = arith.constant dense<0.000000e+00> : vector<16x128xf32>
    %59 = tpu.matmul %57, %58, %cst_19 {dimension_numbers = #tpu.dot_dimension_numbers<[1], [0], [0], [1], [0, 0, 1, 1], [], []>} : vector<16x32xbf16>, vector<32x128xbf16>, vector<16x128xf32> -> vector<16x128xf32>
    %60 = arith.addf %35, %59 : vector<16x128xf32>
    %61 = vector.extract_strided_slice %5 {offsets = [0, 0, 64], sizes = [2, 8, 32], strides = [1, 1, 1]} : vector<2x8x384xbf16> to vector<2x8x32xbf16>
    %62 = vector.extract_strided_slice %5 {offsets = [0, 0, 192], sizes = [2, 8, 32], strides = [1, 1, 1]} : vector<2x8x384xbf16> to vector<2x8x32xbf16>
    %63 = vector.extract_strided_slice %5 {offsets = [0, 0, 320], sizes = [2, 8, 32], strides = [1, 1, 1]} : vector<2x8x384xbf16> to vector<2x8x32xbf16>
    "tpu.trace_start"() <{level = 10 : i32, message = "bqd,bkd->bqk"}> : () -> ()
    %cst_20 = arith.constant dense<0.000000e+00> : vector<2x8x8xf32>
    %64 = tpu.matmul %61, %62, %cst_20 {dimension_numbers = #tpu.dot_dimension_numbers<[2], [2], [1], [1], [0, 0, 0, 1, 1, 1], [0], [0]>} : vector<2x8x32xbf16>, vector<2x8x32xbf16>, vector<2x8x8xf32> -> vector<2x8x8xf32>
    %cst_21 = arith.constant -1.000000e+30 : f32
    "tpu.trace_stop"() : () -> ()
    %65 = vector.shape_cast %9 : vector<1x8x8xi1> to vector<1x8x8xi1>
    %66 = vector.broadcast %65 : vector<1x8x8xi1> to vector<2x8x8xi1>
    %67 = vector.broadcast %cst_21 : f32 to vector<2x8x8xf32>
    %68 = arith.select %66, %64, %67 : vector<2x8x8xi1>, vector<2x8x8xf32>
    %cst_22 = arith.constant dense<0xFF800000> : vector<2x8xf32>
    %69 = vector.multi_reduction <maximumf>, %68, %cst_22 [2] : vector<2x8x8xf32> to vector<2x8xf32>
    %70 = vector.shape_cast %69 : vector<2x8xf32> to vector<2x8x1xf32>
    %71 = vector.broadcast %70 : vector<2x8x1xf32> to vector<2x8x8xf32>
    %72 = arith.subf %68, %71 : vector<2x8x8xf32>
    %73 = math.exp %72 : vector<2x8x8xf32>
    %cst_23 = arith.constant dense<0.000000e+00> : vector<2x8xf32>
    %74 = vector.multi_reduction <add>, %73, %cst_23 [2] : vector<2x8x8xf32> to vector<2x8xf32>
    %75 = vector.shape_cast %74 : vector<2x8xf32> to vector<2x8x1xf32>
    %76 = tpu.reciprocal %75 {approx = true} : vector<2x8x1xf32> -> vector<2x8x1xf32>
    %77 = vector.broadcast %76 : vector<2x8x1xf32> to vector<2x8x8xf32>
    %78 = arith.mulf %73, %77 : vector<2x8x8xf32>
    %79 = arith.truncf %78 : vector<2x8x8xf32> to vector<2x8x8xbf16>
    "tpu.trace_start"() <{level = 10 : i32, message = "bqk,bkd->bqd"}> : () -> ()
    %cst_24 = arith.constant dense<0.000000e+00> : vector<2x8x32xf32>
    %80 = tpu.matmul %79, %63, %cst_24 {dimension_numbers = #tpu.dot_dimension_numbers<[2], [1], [1], [2], [0, 0, 0, 1, 1, 2], [0], [0]>} : vector<2x8x8xbf16>, vector<2x8x32xbf16>, vector<2x8x32xf32> -> vector<2x8x32xf32>
    "tpu.trace_stop"() : () -> ()
    %81 = vector.shape_cast %80 : vector<2x8x32xf32> to vector<16x32xf32>
    %82 = arith.truncf %81 : vector<16x32xf32> to vector<16x32xbf16>
    %c64 = arith.constant 64 : index
    %c0_25 = arith.constant 0 : index
    %83 = vector.load %arg3[%c64, %c0_25] : memref<128x128xbf16, #tpu.memory_space<vmem>>, vector<32x128xbf16>
    %cst_26 = arith.constant dense<0.000000e+00> : vector<16x128xf32>
    %84 = tpu.matmul %82, %83, %cst_26 {dimension_numbers = #tpu.dot_dimension_numbers<[1], [0], [0], [1], [0, 0, 1, 1], [], []>} : vector<16x32xbf16>, vector<32x128xbf16>, vector<16x128xf32> -> vector<16x128xf32>
    %85 = arith.addf %60, %84 : vector<16x128xf32>
    %86 = vector.extract_strided_slice %5 {offsets = [0, 0, 96], sizes = [2, 8, 32], strides = [1, 1, 1]} : vector<2x8x384xbf16> to vector<2x8x32xbf16>
    %87 = vector.extract_strided_slice %5 {offsets = [0, 0, 224], sizes = [2, 8, 32], strides = [1, 1, 1]} : vector<2x8x384xbf16> to vector<2x8x32xbf16>
    %88 = vector.extract_strided_slice %5 {offsets = [0, 0, 352], sizes = [2, 8, 32], strides = [1, 1, 1]} : vector<2x8x384xbf16> to vector<2x8x32xbf16>
    "tpu.trace_start"() <{level = 10 : i32, message = "bqd,bkd->bqk"}> : () -> ()
    %cst_27 = arith.constant dense<0.000000e+00> : vector<2x8x8xf32>
    %89 = tpu.matmul %86, %87, %cst_27 {dimension_numbers = #tpu.dot_dimension_numbers<[2], [2], [1], [1], [0, 0, 0, 1, 1, 1], [0], [0]>} : vector<2x8x32xbf16>, vector<2x8x32xbf16>, vector<2x8x8xf32> -> vector<2x8x8xf32>
    %cst_28 = arith.constant -1.000000e+30 : f32
    "tpu.trace_stop"() : () -> ()
    %90 = vector.shape_cast %9 : vector<1x8x8xi1> to vector<1x8x8xi1>
    %91 = vector.broadcast %90 : vector<1x8x8xi1> to vector<2x8x8xi1>
    %92 = vector.broadcast %cst_28 : f32 to vector<2x8x8xf32>
    %93 = arith.select %91, %89, %92 : vector<2x8x8xi1>, vector<2x8x8xf32>
    %cst_29 = arith.constant dense<0xFF800000> : vector<2x8xf32>
    %94 = vector.multi_reduction <maximumf>, %93, %cst_29 [2] : vector<2x8x8xf32> to vector<2x8xf32>
    %95 = vector.shape_cast %94 : vector<2x8xf32> to vector<2x8x1xf32>
    %96 = vector.broadcast %95 : vector<2x8x1xf32> to vector<2x8x8xf32>
    %97 = arith.subf %93, %96 : vector<2x8x8xf32>
    %98 = math.exp %97 : vector<2x8x8xf32>
    %cst_30 = arith.constant dense<0.000000e+00> : vector<2x8xf32>
    %99 = vector.multi_reduction <add>, %98, %cst_30 [2] : vector<2x8x8xf32> to vector<2x8xf32>
    %100 = vector.shape_cast %99 : vector<2x8xf32> to vector<2x8x1xf32>
    %101 = tpu.reciprocal %100 {approx = true} : vector<2x8x1xf32> -> vector<2x8x1xf32>
    %102 = vector.broadcast %101 : vector<2x8x1xf32> to vector<2x8x8xf32>
    %103 = arith.mulf %98, %102 : vector<2x8x8xf32>
    %104 = arith.truncf %103 : vector<2x8x8xf32> to vector<2x8x8xbf16>
    "tpu.trace_start"() <{level = 10 : i32, message = "bqk,bkd->bqd"}> : () -> ()
    %cst_31 = arith.constant dense<0.000000e+00> : vector<2x8x32xf32>
    %105 = tpu.matmul %104, %88, %cst_31 {dimension_numbers = #tpu.dot_dimension_numbers<[2], [1], [1], [2], [0, 0, 0, 1, 1, 2], [0], [0]>} : vector<2x8x8xbf16>, vector<2x8x32xbf16>, vector<2x8x32xf32> -> vector<2x8x32xf32>
    "tpu.trace_stop"() : () -> ()
    %106 = vector.shape_cast %105 : vector<2x8x32xf32> to vector<16x32xf32>
    %107 = arith.truncf %106 : vector<16x32xf32> to vector<16x32xbf16>
    %c96 = arith.constant 96 : index
    %c0_32 = arith.constant 0 : index
    %108 = vector.load %arg3[%c96, %c0_32] : memref<128x128xbf16, #tpu.memory_space<vmem>>, vector<32x128xbf16>
    %cst_33 = arith.constant dense<0.000000e+00> : vector<16x128xf32>
    %109 = tpu.matmul %107, %108, %cst_33 {dimension_numbers = #tpu.dot_dimension_numbers<[1], [0], [0], [1], [0, 0, 1, 1], [], []>} : vector<16x32xbf16>, vector<32x128xbf16>, vector<16x128xf32> -> vector<16x128xf32>
    %110 = arith.addf %85, %109 : vector<16x128xf32>
    %c0_34 = arith.constant 0 : index
    %c0_35 = arith.constant 0 : index
    %111 = vector.load %arg4[%c0_34, %c0_35] : memref<1x128xf32, #tpu.memory_space<vmem>>, vector<1x128xf32>
    %112 = vector.shape_cast %111 : vector<1x128xf32> to vector<128xf32>
    %113 = vector.shape_cast %112 : vector<128xf32> to vector<1x128xf32>
    %114 = vector.broadcast %113 : vector<1x128xf32> to vector<16x128xf32>
    %115 = arith.addf %110, %114 : vector<16x128xf32>
    %116 = vector.shape_cast %115 : vector<16x128xf32> to vector<2x8x128xf32>
    %c0_36 = arith.constant 0 : index
    %c0_37 = arith.constant 0 : index
    %c0_38 = arith.constant 0 : index
    %117 = vector.load %arg5[%c0_36, %c0_37, %c0_38] : memref<2x8x128xf32, #tpu.memory_space<vmem>>, vector<2x8x128xf32>
    tpu.vector_store %arg5[%c0_36, %c0_37, %c0_38], %116 {strides = array<i32>} : memref<2x8x128xf32, #tpu.memory_space<vmem>>, vector<2x8x128xf32>,
    return
  }
  func.func @transform_0(%arg0: i32) -> (i32, i32, i32) {
    %c0_i32 = arith.constant 0 : i32
    %c0_i32_0 = arith.constant 0 : i32
    %c0_i32_1 = arith.constant 0 : i32
    return %arg0, %c0_i32, %c0_i32_0 : i32, i32, i32
  }
  func.func @transform_1(%arg0: i32) -> (i32, i32) {
    %c0_i32 = arith.constant 0 : i32
    %c0_i32_0 = arith.constant 0 : i32
    %c0_i32_1 = arith.constant 0 : i32
    return %c0_i32, %c0_i32_0 : i32, i32
  }
  func.func @transform_2(%arg0: i32) -> (i32, i32) {
    %c0_i32 = arith.constant 0 : i32
    %c0_i32_0 = arith.constant 0 : i32
    %c0_i32_1 = arith.constant 0 : i32
    return %c0_i32, %c0_i32_0 : i32, i32
  }
  func.func @transform_3(%arg0: i32) -> (i32, i32) {
    %c0_i32 = arith.constant 0 : i32
    %c0_i32_0 = arith.constant 0 : i32
    %c0_i32_1 = arith.constant 0 : i32
    return %c0_i32, %c0_i32_0 : i32, i32
  }
  func.func @transform_4(%arg0: i32) -> (i32, i32, i32) {
    %c0_i32 = arith.constant 0 : i32
    %c0_i32_0 = arith.constant 0 : i32
    %c0_i32_1 = arith.constant 0 : i32
    return %arg0, %c0_i32, %c0_i32_0 : i32, i32, i32
  }
}

</mosaic_0001>

<bundles_post_ra>
// kernel: multi_head_attention.1
= control target key start
LH: loop header
LB: loop body
LE: loop exit
PB: predicated region body
PF: predicated region fallthrough
CT: control target
= control target key end

     0   :  { %v1831_v2 = vmov 0   ;;  %v1832_v3 = vmov 0.0   ;;  %s2204_s0 = inlined_call_operand.vmem [shape: bf16[2,8,128], index: 0, kind: input, shape index: {}]   ;;  %s2205_s1 = inlined_call_operand.vmem [shape: bf16[128,384], index: 1, kind: input, shape index: {}]   ;;  %s2206_s2 = inlined_call_operand.vmem [shape: bf16[128,128], index: 2, kind: input, shape index: {}]   ;;  %s2207_s3 = inlined_call_operand.vmem [shape: f32[1,128], index: 3, kind: input, shape index: {}]   ;;  %s2208_s4 = inlined_call_operand.hbm [shape: f32[2,8,128], index: 4, kind: output, shape index: {}]  }
   0x1   :  { %v1734_v0 = vld [vmem:[%s2205_s1 + $0x4] ss:$12 sps:$4 sm:$0xff]   ;;  %v1736_v1 = vld [vmem:[%s2205_s1] ss:$12 sps:$4 sm:$0xff]   ;;  %219 = vmatprep.mubr.bf16.mxu0 %v1831_v2  ;;  %1577 = vmatprep.subr.bf16.mxu1 %v1832_v3  ;;  %v1737_v4 = vld [vmem:[%s2205_s1 + $0x1c] ss:$12 sps:$4 sm:$0xff]  }
   0x2   :  { %187 = vmatprep.subr.bf16.mxu0 %v1734_v0  ;;  %v1739_v5 = vld [vmem:[%s2205_s1 + $0x18] ss:$12 sps:$4 sm:$0xff]   ;;  %v1740_v6 = vld [vmem:[%s2205_s1 + $0x34] ss:$12 sps:$4 sm:$0xff]   ;;  %v1742_v7 = vld [vmem:[%s2205_s1 + $0x30] ss:$12 sps:$4 sm:$0xff]  }
   0x3   :  { %188 = vmatpush1.bf16.msra.mxu0 %v1736_v1  ;;  %v1743_v8 = vld [vmem:[%s2205_s1 + $0x4c] ss:$12 sps:$4 sm:$0xff]   ;;  %v1745_v9 = vld [vmem:[%s2205_s1 + $0x48] ss:$12 sps:$4 sm:$0xff]   ;;  %v1746_v10 = vld [vmem:[%s2205_s1 + $0x64] ss:$12 sps:$4 sm:$0xff]  }
   0x4   :  { %189 = vmatprep.subr.bf16.mxu0 %v1737_v4  ;;  %v1759_v11 = vld [vmem:[%s2205_s1 + $0x8] ss:$12 sps:$4 sm:$0xff]   ;;  %v1760_v12 = vld [vmem:[%s2205_s1 + $0x20] ss:$12 sps:$4 sm:$0xff]   ;;  %v1751_v15 = vld [vmem:[%s2205_s1 + $0x78] ss:$12 sps:$4 sm:$0xff]  }
   0x5   :  { %1578 = vmatpush3.bf16.msra.mxu1 %v1759_v11  ;;  %v1748_v13 = vld [vmem:[%s2205_s1 + $0x60] ss:$12 sps:$4 sm:$0xff]   ;;  %v1749_v14 = vld [vmem:[%s2205_s1 + $0x7c] ss:$12 sps:$4 sm:$0xff]   ;;  %v1761_v17 = vld [vmem:[%s2205_s1 + $0x38] ss:$12 sps:$4 sm:$0xff]  }
   0x6   :  { %1579 = vmatprep.subr.bf16.mxu1 %v1832_v3  ;;  %v1752_v16 = vld [vmem:[%s2205_s1 + $0x94] ss:$12 sps:$4 sm:$0xff]   ;;  %v1762_v18 = vld [vmem:[%s2205_s1 + $0x50] ss:$12 sps:$4 sm:$0xff]   ;;  %v1755_v20 = vld [vmem:[%s2205_s1 + $0xac] ss:$12 sps:$4 sm:$0xff]  }
   0x7   :  { %190 = vmatpush1.bf16.msra.mxu0 %v1739_v5  ;;  %v1754_v19 = vld [vmem:[%s2205_s1 + $0x90] ss:$12 sps:$4 sm:$0xff]  }
   0x8   :  { %191 = vmatprep.subr.bf16.mxu0 %v1740_v6 }
   0x9   :  { %1580 = vmatpush3.bf16.msra.mxu1 %v1760_v12 }
   0xa   :  { %1581 = vmatprep.subr.bf16.mxu1 %v1832_v3 }
   0xb   :  { %192 = vmatpush1.bf16.msra.mxu0 %v1742_v7 }
   0xc   :  { %193 = vmatprep.subr.bf16.mxu0 %v1743_v8 }
   0xd   :  { %1582 = vmatpush3.bf16.msra.mxu1 %v1761_v17 }
   0xe   :  { %1583 = vmatprep.subr.bf16.mxu1 %v1832_v3 }
   0xf   :  { %194 = vmatpush1.bf16.msra.mxu0 %v1745_v9 }
  0x10   :  { %195 = vmatprep.subr.bf16.mxu0 %v1746_v10 }
  0x13   :  { %196 = vmatpush1.bf16.msra.mxu0 %v1748_v13 }
  0x14   :  { %197 = vmatprep.subr.bf16.mxu0 %v1749_v14 }
  0x17   :  { %198 = vmatpush1.bf16.msra.mxu0 %v1751_v15 }
  0x18   :  { %199 = vmatprep.subr.bf16.mxu0 %v1752_v16 }
  0x19   :  { %9 = vsyncpa [#allocation3], 0  ;;  %1584 = vmatpush3.bf16.msra.mxu1 %v1762_v18  ;;  %v1763_v21 = vld [vmem:[%s2205_s1 + $0x68] ss:$12 sps:$4 sm:$0xff]   ;;  %v1758_v23 = vld [vmem:[%s2204_s0] sm:$0xff]   ;;  %vm1833_vm0 = vmmov 0   ;;  %v287_v45 = vlaneseq }
  0x1a   :  { %v1757_v22 = vld [vmem:[%s2205_s1 + $0xa8] ss:$12 sps:$4 sm:$0xff]   ;;  %1585 = vmatprep.subr.bf16.mxu1 %v1832_v3  ;;  %v1764_v24 = vld [vmem:[%s2205_s1 + $0x80] ss:$12 sps:$4 sm:$0xff]   ;;  %v1765_v25 = vld [vmem:[%s2205_s1 + $0x98] ss:$12 sps:$4 sm:$0xff]   ;;  %1593 = vmatprep.mubr.msk.bf16.mxu1 %vm1833_vm0, %v1832_v3 }
  0x1b   :  { %200 = vmatpush1.bf16.msra.mxu0 %v1754_v19  ;;  %v1766_v26 = vld [vmem:[%s2205_s1 + $0xb0] ss:$12 sps:$4 sm:$0xff]   ;;  %vm293_vm1 = vcmask 261120   ;;  %s1834_s1 = smov 96   ;;  %vm419_vm2 = vcmask 1043456   ;;  %v288_v46 = vshrl.u32 %v287_v45, 7 }
  0x1c   :  { %201 = vmatprep.subr.bf16.mxu0 %v1755_v20  ;;  %v290_v47 = vand.u32 127, %v287_v45  ;;  %vm391_vm4 = vcmask 64512   ;;  %s1835_s12 = smov 64   ;;  %s1836_s21 = smov 32  }
  0x1d   :  { %1586 = vmatpush3.bf16.msra.mxu1 %v1763_v21 }
  0x1e   :  { %1587 = vmatprep.subr.bf16.mxu1 %v1832_v3  ;;  %vm1992_vm3 = vcmp.le.s32.totalorder %v290_v47, %v288_v46 }
  0x1f   :  { %202 = vmatpush1.bf16.msra.mxu0 %v1757_v22 }
  0x20   :  { %1597 = vmatprep.subr.bf16.mxu0 %v1832_v3 }
  0x21   :  { %1588 = vmatpush3.bf16.msra.mxu1 %v1764_v24 }
  0x22   :  { %220 = vmatmul.mubr.bf16.vlgmr.msra.gmra.mrb[0].mxu0 %v1758_v23  ;;  %1589 = vmatprep.subr.bf16.mxu1 %v1832_v3 }
  0x23   :  { %1599 = vmatprep.mubr.msk.bf16.mxu0 %vm1833_vm0, %v1832_v3 }
  0x25   :  { %1590 = vmatpush3.bf16.msra.mxu1 %v1765_v25 }
  0x26   :  { %1591 = vmatprep.subr.bf16.mxu1 %v1832_v3 }
  0x29   :  { %1592 = vmatpush3.bf16.msra.mxu1 %v1766_v26 }
  0x2a   :  { %1603 = vmatprep.subr.bf16.mxu1 %v1832_v3 }
  0x2c   :  { %1594 = vmatmul.mubr.bf16.vlgmr.msra.gmra.mrb[0].mxu1 %v1758_v23 }
  0x2d   :  { %1605 = vmatprep.mubr.msk.bf16.mxu1 %vm1833_vm0, %v1832_v3 }
  0xf5   :  { %v1956_v27 = vpop.f32.mrb[0].mxu0 }
  0xf6   :  { %v223_v28 = vpop.f32.mrb[1].mxu0  ;;  %v2008_v8 = vpack.c.bf16 %v1956_v27, %v1956_v27 }
  0xf7   :  { %v1959_v29 = vpack.c.bf16 %v223_v28, %v1956_v27  ;;  %v1961_v30 = vpop.f32.mrb[2].mxu0 }
  0xf8   :  { %v227_v31 = vpop.f32.mrb[3].mxu0  ;;  %v2014_v9 = vpack.c.bf16 %v1961_v30, %v1961_v30 }
  0xf9   :  { %v1964_v32 = vpack.c.bf16 %v227_v31, %v1961_v30  ;;  %v292_v33 = vrot.slane %v1959_v29, 4 }
  0xfb   :  { %566 = vrot.lane.b32.xlu1 %v1964_v32, %s1834_s1  ;;  %v298_v34 = vsel %vm293_vm1, %v292_v33, 0  ;;  %v340_v35 = vrot.slane %v1964_v32, 4 }
  0xfc   :  { %1598 = vmatpush3.bf16.xpose.msra.mxu0 %v298_v34 }
  0xfd   :  { %v345_v36 = vsel %vm293_vm1, %v340_v35, 0  ;;  %1609 = vmatprep.subr.bf16.mxu0 %v1832_v3 }
  0xfe   :  { %1604 = vmatpush3.bf16.xpose.msra.mxu1 %v345_v36 }
  0xff   :  { %1615 = vmatprep.subr.bf16.mxu1 %v1832_v3  ;;  %v264_v37 = vpop.f32.mrb[0].mxu1 }
 0x100   :  { %v1595_v38 = vpop.f32.mrb[1].mxu1  ;;  %v1982_v39 = vpack.c.bf16 %v264_v37, %v264_v37 }
 0x101   :  { %v267_v40 = vpop.f32.mrb[2].mxu1 }
 0x102   :  { %v1984_v41 = vpack.c.bf16 %v267_v40, %v267_v40  ;;  %v1596_v42 = vpop.f32.mrb[3].mxu1  ;;  %v421_v43 = vsel %vm419_vm2, %v1982_v39, 0 }
 0x103   :  { %1600 = vmatmul.mubr.msk.bf16.vlgmr.msra.gmra.mrb[4].mxu0 %vm293_vm1, %v1959_v29 }
 0x104   :  { %1611 = vmatprep.mubr.msk.bf16.mxu0 %vm1833_vm0, %v1832_v3  ;;  %v467_v44 = vsel %vm419_vm2, %v1984_v41, 0  ;;  %1610 = vmatpush3.bf16.msra.mxu0 %v421_v43 }
 0x105   :  { %1606 = vmatmul.mubr.msk.bf16.vlgmr.msra.gmra.mrb[4].mxu1 %vm293_vm1, %v1964_v32  ;;  %1621 = vmatprep.subr.bf16.mxu0 %v1832_v3 }
 0x106   :  { %1617 = vmatprep.mubr.msk.bf16.mxu1 %vm1833_vm0, %v1832_v3  ;;  %1616 = vmatpush3.bf16.msra.mxu1 %v467_v44 }
 0x107   :  { %1627 = vmatprep.subr.bf16.mxu1 %v1832_v3 }
 0x16d   :  { %v567_v10 = vpop.permute.xlu1 %566 }
 0x16e   :  { %v568_v19 = vrot.slane %v567_v10, 4 }
 0x170   :  { %v576_v23 = vsel %vm293_vm1, %v568_v19, 0 }
 0x1d6   :  { %v334_v49 = vpop.f32.mrb[4].mxu0 }
 0x1d7   :  { %v389_v50 = vsel %vm1992_vm3, %v334_v49, -1e+30  ;;  %v1601_v51 = vpop.f32.mrb[5].mxu0 }
 0x1d8   :  { %v337_v52 = vpop.f32.mrb[6].mxu0  ;;  %v381_v53 = vpop.f32.mrb[4].mxu1  ;;  %v392_v54 = vsel %vm391_vm4, %v389_v50, -inf }
 0x1d9   :  { %v390_v55 = vsel %vm1992_vm3, %v381_v53, -1e+30  ;;  %393 = vmax.xlane.f32.xlu0 %v392_v54  ;;  %v1602_v56 = vpop.f32.mrb[7].mxu0  ;;  %v1607_v57 = vpop.f32.mrb[5].mxu1 }
 0x1da   :  { %v384_v58 = vpop.f32.mrb[6].mxu1  ;;  %v395_v60 = vsel %vm391_vm4, %v390_v55, -inf }
 0x1db   :  { %v1608_v59 = vpop.f32.mrb[7].mxu1 }
 0x1dd   :  { %396 = vmax.xlane.f32.xlu0 %v395_v60 }
 0x1f3   :  { %514 = vrot.lane.b32.xlu0 %v1959_v29, %s1834_s1 }
 0x266   :  { %v394_v61 = vpop.xlane.xlu0 %393 }
 0x267   :  { %v398_v62 = vsub.f32 %v389_v50, %v394_v61 }
 0x269   :  { %v400_v63 = vmul.f32 1.442695, %v398_v62 }
 0x26a   :  { %v397_v0 = vpop.xlane.xlu0 %396 }
 0x26b   :  { %1775 = vpow2.f32 %v400_v63  ;;  %v399_v1 = vsub.f32 %v390_v55, %v397_v0 }
 0x26d   :  { %v402_v2 = vmul.f32 1.442695, %v399_v1 }
 0x26e   :  { %v515_v13 = vpop.permute.xlu0 %514 }
 0x26f   :  { %1777 = vpow2.f32 %v402_v2  ;;  %v516_v15 = vrot.slane %v515_v13, 4  ;;  %v1767_v13 = vld [vmem:[%s2206_s2] sm:$0xff]  }
 0x271   :  { %v524_v20 = vsel %vm293_vm1, %v516_v15, 0  ;;  %v1770_v15 = vld [vmem:[%s2206_s2 + $0x18] sm:$0xff]  }
 0x275   :  { %v1776_v4 = vpop.eup %1775 }
 0x276   :  { %v404_v5 = vsel %vm391_vm4, %v1776_v4, 0.0 }
 0x277   :  { %405 = vadd.xlane.f32.xlu1 %v404_v5 }
 0x279   :  { %v1778_v6 = vpop.eup %1777 }
 0x27a   :  { %v407_v7 = vsel %vm391_vm4, %v1778_v6, 0.0 }
 0x27b   :  { %408 = vadd.xlane.f32.xlu1 %v407_v7  ;;  %v1769_v7 = vld [vmem:[%s2206_s2 + $0x10] sm:$0xff]  }
 0x28c   :  { %518 = vrot.lane.b32.xlu1 %v2008_v8, %s1834_s1 }
 0x290   :  { %570 = vrot.lane.b32.xlu1 %v2014_v9, %s1834_s1 }
 0x304   :  { %v406_v11 = vpop.xlane.xlu1 %405 }
 0x305   :  { %1779 = vrcp.f32 %v406_v11 }
 0x308   :  { %v409_v12 = vpop.xlane.xlu1 %408 }
 0x309   :  { %1781 = vrcp.f32 %v409_v12 }
 0x30c   :  { %v519_v24 = vpop.permute.xlu1 %518 }
 0x30f   :  { %v1780_v14 = vpop.eup %1779 }
 0x310   :  { %v412_v16 = vmul.f32 %v1780_v14, %v1776_v4  ;;  %v571_v25 = vpop.permute.xlu1 %570 }
 0x312   :  { %v414_v17 = vpack.c.bf16 %v412_v16, %v412_v16 }
 0x313   :  { %v1782_v18 = vpop.eup %1781 }
 0x314   :  { %v413_v21 = vmul.f32 %v1782_v18, %v1778_v6  ;;  %1612 = vmatmul.mubr.msk.bf16.vlgmr.msra.gmra.mrb[8].mxu0 %vm391_vm4, %v414_v17  ;;  %v1768_v17 = vld [vmem:[%s2206_s2 + $0x8] sm:$0xff]  }
 0x315   :  { %1622 = vmatpush3.bf16.xpose.msra.mxu0 %v524_v20  ;;  %1623 = vmatprep.mubr.msk.bf16.mxu0 %vm1833_vm0, %v1832_v3 }
 0x316   :  { %v415_v22 = vpack.c.bf16 %v413_v21, %v413_v21  ;;  %1633 = vmatprep.subr.bf16.mxu0 %v1832_v3 }
 0x318   :  { %1618 = vmatmul.mubr.msk.bf16.vlgmr.msra.gmra.mrb[8].mxu1 %vm391_vm4, %v415_v22 }
 0x319   :  { %1628 = vmatpush3.bf16.xpose.msra.mxu1 %v576_v23  ;;  %1629 = vmatprep.mubr.msk.bf16.mxu1 %vm1833_vm0, %v1832_v3 }
 0x31a   :  { %1639 = vmatprep.subr.bf16.mxu1 %v1832_v3 }
 0x31c   :  { %1624 = vmatmul.mubr.msk.bf16.vlgmr.msra.gmra.mrb[12].mxu0 %vm293_vm1, %v519_v24 }
 0x31d   :  { %1635 = vmatprep.mubr.msk.bf16.mxu0 %vm1833_vm0, %v1832_v3 }
 0x320   :  { %1630 = vmatmul.mubr.msk.bf16.vlgmr.msra.gmra.mrb[12].mxu1 %vm293_vm1, %v571_v25 }
 0x321   :  { %1641 = vmatprep.mubr.msk.bf16.mxu1 %vm1833_vm0, %v1832_v3 }
 0x3e7   :  { %v2034_v26 = vpop.f32.mrb[8].mxu0 }
 0x3e8   :  { %v1613_v27 = vpop.f32.mrb[9].mxu0 }
 0x3e9   :  { %v460_v28 = vpop.f32.mrb[10].mxu0 }
 0x3ea   :  { %v1614_v30 = vpop.f32.mrb[11].mxu0 }
 0x3eb   :  { %v2036_v31 = vpop.f32.mrb[8].mxu1 }
 0x3ec   :  { %v509_v33 = vpack.c.bf16 %v2036_v31, %v2034_v26  ;;  %v1619_v34 = vpop.f32.mrb[9].mxu1 }
 0x3ed   :  { %v506_v35 = vpop.f32.mrb[10].mxu1 }
 0x3ee   :  { %v1620_v36 = vpop.f32.mrb[11].mxu1 }
 0x3ef   :  { %v560_v37 = vpop.f32.mrb[12].mxu0 }
 0x3f0   :  { %v618_v38 = vsel %vm1992_vm3, %v560_v37, -1e+30  ;;  %v1625_v40 = vpop.f32.mrb[13].mxu0 }
 0x3f1   :  { %v563_v42 = vpop.f32.mrb[14].mxu0  ;;  %v620_v43 = vsel %vm391_vm4, %v618_v38, -inf }
 0x3f2   :  { %621 = vmax.xlane.f32.xlu0 %v620_v43  ;;  %v1626_v44 = vpop.f32.mrb[15].mxu0 }
 0x3f3   :  { %v612_v45 = vpop.f32.mrb[12].mxu1 }
 0x3f4   :  { %v619_v46 = vsel %vm1992_vm3, %v612_v45, -1e+30  ;;  %v1631_v47 = vpop.f32.mrb[13].mxu1 }
 0x3f5   :  { %v615_v49 = vpop.f32.mrb[14].mxu1  ;;  %v623_v50 = vsel %vm391_vm4, %v619_v46, -inf }
 0x3f6   :  { %624 = vmax.xlane.f32.xlu1 %v623_v50  ;;  %v1632_v51 = vpop.f32.mrb[15].mxu1 }
 0x407   :  { %692 = vrot.lane.b32.xlu1 %v1984_v41, %s1834_s1 }
 0x40b   :  { %857 = vrot.lane.b32.xlu1 %v1959_v29, %s1835_s12 }
 0x40f   :  { %908 = vrot.lane.b32.xlu1 %v1964_v32, %s1835_s12 }
 0x413   :  { %911 = vrot.lane.b32.xlu1 %v2014_v9, %s1835_s12 }
 0x47f   :  { %v622_v52 = vpop.xlane.xlu0 %621 }
 0x480   :  { %v626_v53 = vsub.f32 %v618_v38, %v622_v52 }
 0x482   :  { %v628_v54 = vmul.f32 1.442695, %v626_v53 }
 0x483   :  { %v625_v55 = vpop.xlane.xlu1 %624 }
 0x484   :  { %1783 = vpow2.f32 %v628_v54  ;;  %v627_v56 = vsub.f32 %v619_v46, %v625_v55 }
 0x486   :  { %v630_v57 = vmul.f32 1.442695, %v627_v56 }
 0x487   :  { %v693_v58 = vpop.permute.xlu1 %692 }
 0x488   :  { %1785 = vpow2.f32 %v630_v57  ;;  %v698_v59 = vsel %vm419_vm2, %v693_v58, 0 }
 0x489   :  { %1640 = vmatpush3.bf16.msra.mxu1 %v698_v59 }
 0x48a   :  { %1653 = vmatprep.subr.bf16.mxu1 %v1832_v3 }
 0x48b   :  { %v858_v16 = vpop.permute.xlu1 %857 }
 0x48c   :  { %v859_v25 = vrot.slane %v858_v16, 4 }
 0x48e   :  { %v1784_v60 = vpop.eup %1783 }
 0x48f   :  { %v632_v61 = vsel %vm391_vm4, %v1784_v60, 0.0  ;;  %v909_v18 = vpop.permute.xlu1 %908 }
 0x490   :  { %633 = vadd.xlane.f32.xlu0 %v632_v61  ;;  %v910_v19 = vrot.slane %v909_v18, 4 }
 0x492   :  { %v1786_v62 = vpop.eup %1785  ;;  %v917_v20 = vsel %vm293_vm1, %v910_v19, 0 }
 0x493   :  { %v635_v63 = vsel %vm391_vm4, %v1786_v62, 0.0  ;;  %v912_v21 = vpop.permute.xlu1 %911 }
 0x494   :  { %636 = vadd.xlane.f32.xlu0 %v635_v63 }
 0x4aa   :  { %644 = vrot.lane.b32.xlu0 %v1982_v39, %s1834_s1 }
 0x4ae   :  { %860 = vrot.lane.b32.xlu0 %v2008_v8, %s1835_s12 }
 0x51d   :  { %v634_v0 = vpop.xlane.xlu0 %633 }
 0x51e   :  { %1787 = vrcp.f32 %v634_v0 }
 0x521   :  { %v637_v1 = vpop.xlane.xlu0 %636 }
 0x522   :  { %1789 = vrcp.f32 %v637_v1 }
 0x525   :  { %v645_v2 = vpop.permute.xlu0 %644 }
 0x526   :  { %v650_v4 = vsel %vm419_vm2, %v645_v2, 0 }
 0x527   :  { %1634 = vmatpush3.bf16.msra.mxu0 %v650_v4 }
 0x528   :  { %v1788_v5 = vpop.eup %1787  ;;  %1645 = vmatprep.subr.bf16.mxu0 %v1832_v3 }
 0x529   :  { %v640_v6 = vmul.f32 %v1788_v5, %v1784_v60  ;;  %v861_v37 = vpop.permute.xlu0 %860 }
 0x52b   :  { %v642_v10 = vpack.c.bf16 %v640_v6, %v640_v6 }
 0x52c   :  { %v1790_v11 = vpop.eup %1789 }
 0x52d   :  { %v641_v12 = vmul.f32 %v1790_v11, %v1786_v62  ;;  %1636 = vmatmul.mubr.msk.bf16.vlgmr.msra.gmra.mrb[16].mxu0 %vm391_vm4, %v642_v10 }
 0x52e   :  { %1646 = vmatpush3.bf16.msra.mxu0 %v1769_v7  ;;  %1649 = vmatprep.mubr.msk.bf16.mxu0 %vm1833_vm0, %v1832_v3 }
 0x52f   :  { %v643_v14 = vpack.c.bf16 %v641_v12, %v641_v12  ;;  %1647 = vmatprep.subr.bf16.mxu0 %v1832_v3 }
 0x531   :  { %1642 = vmatmul.mubr.msk.bf16.vlgmr.msra.gmra.mrb[16].mxu1 %vm391_vm4, %v643_v14 }
 0x532   :  { %1654 = vmatpush3.bf16.msra.mxu1 %v1767_v13  ;;  %1657 = vmatprep.mubr.msk.bf16.mxu1 %vm1833_vm0, %v1832_v3 }
 0x533   :  { %1655 = vmatprep.subr.bf16.mxu1 %v1832_v3  ;;  %1648 = vmatpush3.bf16.msra.mxu0 %v1770_v15 }
 0x534   :  { %1661 = vmatprep.subr.bf16.mxu0 %v1832_v3 }
 0x536   :  { %1656 = vmatpush3.bf16.msra.mxu1 %v1768_v17 }
 0x537   :  { %1667 = vmatprep.subr.bf16.mxu1 %v1832_v3 }
 0x539   :  { %1658 = vmatmul.mubr.msk.bf16.vlgmr.msra.gmra.mrb[20].mxu1 %vm293_vm1, %v509_v33  ;;  %v866_v33 = vsel %vm293_vm1, %v859_v25, 0 }
 0x53a   :  { %1669 = vmatprep.mubr.msk.bf16.mxu1 %vm1833_vm0, %v1832_v3 }
 0x53f   :  { %1668 = vmatpush3.bf16.xpose.msra.mxu1 %v917_v20 }
 0x540   :  { %1679 = vmatprep.subr.bf16.mxu1 %v1832_v3 }
 0x546   :  { %1670 = vmatmul.mubr.msk.bf16.vlgmr.msra.gmra.mrb[24].mxu1 %vm293_vm1, %v912_v21 }
 0x547   :  { %1681 = vmatprep.mubr.msk.bf16.mxu1 %vm1833_vm0, %v1832_v3 }
 0x600   :  { %v686_v22 = vpop.f32.mrb[16].mxu0 }
 0x601   :  { %v1637_v23 = vpop.f32.mrb[17].mxu0 }
 0x602   :  { %v689_v24 = vpop.f32.mrb[18].mxu0 }
 0x603   :  { %v1638_v26 = vpop.f32.mrb[19].mxu0 }
 0x604   :  { %v734_v27 = vpop.f32.mrb[16].mxu1 }
 0x605   :  { %v740_v28 = vpack.c.bf16 %v734_v27, %v686_v22  ;;  %v1643_v30 = vpop.f32.mrb[17].mxu1  ;;  %v1772_v27 = vld [vmem:[%s2206_s2 + $0x28] sm:$0xff]  }
 0x606   :  { %v737_v31 = vpop.f32.mrb[18].mxu1 }
 0x607   :  { %v1644_v34 = vpop.f32.mrb[19].mxu1  ;;  %1650 = vmatmul.mubr.msk.bf16.vlgmr.msra.gmra.mrb[20].mxu0 %vm293_vm1, %v740_v28 }
 0x608   :  { %1662 = vmatpush3.bf16.xpose.msra.mxu0 %v866_v33  ;;  %1663 = vmatprep.mubr.msk.bf16.mxu0 %vm1833_vm0, %v1832_v3 }
 0x609   :  { %1673 = vmatprep.subr.bf16.mxu0 %v1832_v3 }
 0x60c   :  { %v850_v35 = vpop.f32.mrb[20].mxu1 }
 0x60d   :  { %v1659_v36 = vpop.f32.mrb[21].mxu1 }
 0x60e   :  { %v853_v38 = vpop.f32.mrb[22].mxu1 }
 0x60f   :  { %v1660_v40 = vpop.f32.mrb[23].mxu1  ;;  %1664 = vmatmul.mubr.msk.bf16.vlgmr.msra.gmra.mrb[24].mxu0 %vm293_vm1, %v861_v37 }
 0x610   :  { %1675 = vmatprep.mubr.msk.bf16.mxu0 %vm1833_vm0, %v1832_v3 }
 0x619   :  { %v953_v42 = vpop.f32.mrb[24].mxu1 }
 0x61a   :  { %v960_v43 = vsel %vm1992_vm3, %v953_v42, -1e+30  ;;  %v1671_v44 = vpop.f32.mrb[25].mxu1 }
 0x61b   :  { %v956_v45 = vpop.f32.mrb[26].mxu1  ;;  %v964_v46 = vsel %vm391_vm4, %v960_v43, -inf }
 0x61c   :  { %965 = vmax.xlane.f32.xlu1 %v964_v46  ;;  %v1672_v47 = vpop.f32.mrb[27].mxu1 }
 0x62d   :  { %1033 = vrot.lane.b32.xlu1 %v1984_v41, %s1835_s12 }
 0x631   :  { %1144 = vrot.lane.b32.xlu1 %v1959_v29, %s1836_s21 }
 0x635   :  { %1195 = vrot.lane.b32.xlu1 %v1964_v32, %s1836_s21 }
 0x639   :  { %1198 = vrot.lane.b32.xlu1 %v2014_v9, %s1836_s21 }
 0x6a9   :  { %v966_v49 = vpop.xlane.xlu1 %965 }
 0x6aa   :  { %v968_v52 = vsub.f32 %v960_v43, %v966_v49 }
 0x6ac   :  { %v971_v53 = vmul.f32 1.442695, %v968_v52 }
 0x6ad   :  { %v1034_v50 = vpop.permute.xlu1 %1033 }
 0x6ae   :  { %v1039_v51 = vsel %vm419_vm2, %v1034_v50, 0  ;;  %1791 = vpow2.f32 %v971_v53 }
 0x6af   :  { %1680 = vmatpush3.bf16.msra.mxu1 %v1039_v51 }
 0x6b0   :  { %1693 = vmatprep.subr.bf16.mxu1 %v1832_v3 }
 0x6b1   :  { %v1145_v6 = vpop.permute.xlu1 %1144 }
 0x6b2   :  { %v1146_v12 = vrot.slane %v1145_v6, 4 }
 0x6b4   :  { %v1153_v15 = vsel %vm293_vm1, %v1146_v12, 0 }
 0x6b8   :  { %v1792_v62 = vpop.eup %1791 }
 0x6b9   :  { %v976_v0 = vsel %vm391_vm4, %v1792_v62, 0.0 }
 0x6da   :  { %v794_v54 = vpop.f32.mrb[20].mxu0 }
 0x6db   :  { %v2118_v55 = vadd.f32 %v850_v35, %v794_v54  ;;  %v1651_v29 = vpop.f32.mrb[21].mxu0  ;;  %v1196_v35 = vpop.permute.xlu1 %1195 }
 0x6dc   :  { %v797_v56 = vpop.f32.mrb[22].mxu0  ;;  %v1197_v37 = vrot.slane %v1196_v35, 4 }
 0x6dd   :  { %v2120_v57 = vadd.f32 %v853_v38, %v797_v56  ;;  %v1652_v32 = vpop.f32.mrb[23].mxu0 }
 0x6de   :  { %v1204_v44 = vsel %vm293_vm1, %v1197_v37, 0 }
 0x6df   :  { %v1199_v46 = vpop.permute.xlu1 %1198 }
 0x6e2   :  { %v902_v58 = vpop.f32.mrb[24].mxu0 }
 0x6e3   :  { %v959_v9 = vsel %vm1992_vm3, %v902_v58, -1e+30  ;;  %v1665_v59 = vpop.f32.mrb[25].mxu0 }
 0x6e4   :  { %v905_v60 = vpop.f32.mrb[26].mxu0  ;;  %v961_v61 = vsel %vm391_vm4, %v959_v9, -inf }
 0x6e5   :  { %962 = vmax.xlane.f32.xlu0 %v961_v61  ;;  %v1666_v63 = vpop.f32.mrb[27].mxu0 }
 0x6e9   :  { %977 = vadd.xlane.f32.xlu0 %v976_v0 }
 0x772   :  { %v963_v1 = vpop.xlane.xlu0 %962 }
 0x773   :  { %v967_v2 = vsub.f32 %v959_v9, %v963_v1 }
 0x775   :  { %v969_v4 = vmul.f32 1.442695, %v967_v2 }
 0x776   :  { %v978_v5 = vpop.xlane.xlu0 %977 }
 0x777   :  { %1793 = vpow2.f32 %v969_v4 }
 0x778   :  { %1795 = vrcp.f32 %v978_v5 }
 0x781   :  { %v1794_v7 = vpop.eup %1793 }
 0x782   :  { %v1796_v10 = vpop.eup %1795  ;;  %v973_v11 = vsel %vm391_vm4, %v1794_v7, 0.0 }
 0x783   :  { %v982_v13 = vmul.f32 %v1796_v10, %v1792_v62  ;;  %974 = vadd.xlane.f32.xlu0 %v973_v11 }
 0x785   :  { %v984_v14 = vpack.c.bf16 %v982_v13, %v982_v13 }
 0x787   :  { %1682 = vmatmul.mubr.msk.bf16.vlgmr.msra.gmra.mrb[28].mxu1 %vm391_vm4, %v984_v14 }
 0x788   :  { %1694 = vmatpush3.bf16.xpose.msra.mxu1 %v1153_v15  ;;  %1695 = vmatprep.mubr.msk.bf16.mxu1 %vm1833_vm0, %v1832_v3  ;;  %v1773_v15 = vld [vmem:[%s2206_s2 + $0x30] sm:$0xff]  }
 0x789   :  { %1705 = vmatprep.subr.bf16.mxu1 %v1832_v3 }
 0x799   :  { %985 = vrot.lane.b32.xlu0 %v1982_v39, %s1835_s12 }
 0x79d   :  { %1147 = vrot.lane.b32.xlu0 %v2008_v8, %s1836_s21  ;;  %v1771_v8 = vld [vmem:[%s2206_s2 + $0x20] sm:$0xff]  }
 0x810   :  { %v975_v16 = vpop.xlane.xlu0 %974 }
 0x811   :  { %1797 = vrcp.f32 %v975_v16  ;;  %v1774_v16 = vld [vmem:[%s2206_s2 + $0x38] sm:$0xff]   ;;  %s1837_s2 = smov [#allocation2]  }
 0x812   :  { %s1447_s6 = sshll.u32 %s1837_s2, 4  ;;  %s1448_s6 = int_to_ptr.vmem [resolvable:$true] %s1447_s6 }
 0x813   :  { %s1807_s7 = scalar_lea.vmem %s1448_s6, 256  ;;  %p1812_p1 = scmp.lt.s32.totalorder %s1448_s6, %s1448_s6 }
 0x814   :  { %v986_v17 = vpop.permute.xlu0 %985  ;;  %p1808_p0 = scmp.ne.s32.totalorder %s1448_s6, %s1807_s7  ;;  %p1813_p2 = scmp.lt.s32.totalorder %s1807_s7, %s1807_s7 }
 0x815   :  { %v991_v18 = vsel %vm419_vm2, %v986_v17, 0 }
 0x816   :  { %1674 = vmatpush3.bf16.msra.mxu0 %v991_v18  ;;  %p1814_p3 = por %p1813_p2, %p1812_p1 }
 0x817   :  { %1685 = vmatprep.subr.bf16.mxu0 %v1832_v3 }
 0x818   :  { %v1148_v19 = vpop.permute.xlu0 %1147  ;;  %p1815_p4 = pnand %p1814_p3, %p1808_p0 }
 0x819   :  { %1696 = vmatmul.mubr.msk.bf16.vlgmr.msra.gmra.mrb[32].mxu1 %vm293_vm1, %v1148_v19 }
 0x81a   :  { %1707 = vmatprep.mubr.msk.bf16.mxu1 %vm1833_vm0, %v1832_v3 }
 0x81b   :  { %v1798_v20 = vpop.eup %1797 }
 0x81c   :  { %v981_v21 = vmul.f32 %v1798_v20, %v1794_v7 }
 0x81e   :  { %v983_v22 = vpack.c.bf16 %v981_v21, %v981_v21 }
 0x820   :  { %1676 = vmatmul.mubr.msk.bf16.vlgmr.msra.gmra.mrb[28].mxu0 %vm391_vm4, %v983_v22 }
 0x821   :  { %1686 = vmatpush3.bf16.msra.mxu0 %v1771_v8  ;;  %1689 = vmatprep.mubr.msk.bf16.mxu0 %vm1833_vm0, %v1832_v3 }
 0x822   :  { %1687 = vmatprep.subr.bf16.mxu0 %v1832_v3 }
 0x825   :  { %1688 = vmatpush3.bf16.msra.mxu0 %v1772_v27 }
 0x826   :  { %1699 = vmatprep.subr.bf16.mxu0 %v1832_v3 }
 0x85a   :  { %v1075_v23 = vpop.f32.mrb[28].mxu1 }
 0x85b   :  { %v1683_v24 = vpop.f32.mrb[29].mxu1 }
 0x85c   :  { %v1078_v25 = vpop.f32.mrb[30].mxu1 }
 0x85d   :  { %v1684_v26 = vpop.f32.mrb[31].mxu1 }
 0x8ec   :  { %v1189_v28 = vpop.f32.mrb[32].mxu1 }
 0x8ed   :  { %v1246_v30 = vsel %vm1992_vm3, %v1189_v28, -1e+30  ;;  %v1697_v31 = vpop.f32.mrb[33].mxu1 }
 0x8ee   :  { %v1192_v33 = vpop.f32.mrb[34].mxu1  ;;  %v1248_v34 = vsel %vm391_vm4, %v1246_v30, -inf }
 0x8ef   :  { %1249 = vmax.xlane.f32.xlu0 %v1248_v34  ;;  %v1698_v36 = vpop.f32.mrb[35].mxu1 }
 0x8f3   :  { %v1027_v38 = vpop.f32.mrb[28].mxu0 }
 0x8f4   :  { %v1081_v40 = vpack.c.bf16 %v1075_v23, %v1027_v38  ;;  %v1677_v42 = vpop.f32.mrb[29].mxu0 }
 0x8f5   :  { %v1030_v43 = vpop.f32.mrb[30].mxu0 }
 0x8f6   :  { %v1678_v45 = vpop.f32.mrb[31].mxu0  ;;  %1690 = vmatmul.mubr.msk.bf16.vlgmr.msra.gmra.mrb[32].mxu0 %vm293_vm1, %v1081_v40 }
 0x8f7   :  { %1700 = vmatpush3.bf16.xpose.msra.mxu0 %v1204_v44  ;;  %1701 = vmatprep.mubr.msk.bf16.mxu0 %vm1833_vm0, %v1832_v3 }
 0x8f8   :  { %1711 = vmatprep.subr.bf16.mxu0 %v1832_v3 }
 0x8fe   :  { %1702 = vmatmul.mubr.msk.bf16.vlgmr.msra.gmra.mrb[36].mxu0 %vm293_vm1, %v1199_v46 }
 0x8ff   :  { %1713 = vmatprep.mubr.msk.bf16.mxu0 %vm1833_vm0, %v1832_v3 }
 0x97c   :  { %v1250_v47 = vpop.xlane.xlu0 %1249 }
 0x97d   :  { %v1254_v49 = vsub.f32 %v1246_v30, %v1250_v47 }
 0x97f   :  { %v1256_v50 = vmul.f32 1.442695, %v1254_v49 }
 0x981   :  { %1799 = vpow2.f32 %v1256_v50 }
 0x98b   :  { %v1800_v51 = vpop.eup %1799 }
 0x98c   :  { %v1260_v52 = vsel %vm391_vm4, %v1800_v51, 0.0 }
 0x98d   :  { %1261 = vadd.xlane.f32.xlu0 %v1260_v52 }
 0x9c9   :  { %v1135_v53 = vpop.f32.mrb[32].mxu0 }
 0x9ca   :  { %v1142_v54 = vadd.f32 %v1135_v53, %v2118_v55  ;;  %v1691_v29 = vpop.f32.mrb[33].mxu0 }
 0x9cb   :  { %v1138_v56 = vpop.f32.mrb[34].mxu0 }
 0x9cc   :  { %v1143_v32 = vadd.f32 %v1138_v56, %v2120_v57  ;;  %v1692_v58 = vpop.f32.mrb[35].mxu0 }
 0x9d1   :  { %v1240_v9 = vpop.f32.mrb[36].mxu0 }
 0x9d2   :  { %v1247_v59 = vsel %vm1992_vm3, %v1240_v9, -1e+30  ;;  %v1703_v60 = vpop.f32.mrb[37].mxu0 }
 0x9d3   :  { %v1243_v61 = vpop.f32.mrb[38].mxu0  ;;  %v1251_v62 = vsel %vm391_vm4, %v1247_v59, -inf }
 0x9d4   :  { %1252 = vmax.xlane.f32.xlu1 %v1251_v62  ;;  %v1704_v63 = vpop.f32.mrb[39].mxu0 }
 0x9e5   :  { %1320 = vrot.lane.b32.xlu1 %v1984_v41, %s1836_s21 }
 0xa1a   :  { %v1262_v5 = vpop.xlane.xlu0 %1261 }
 0xa61   :  { %v1253_v0 = vpop.xlane.xlu1 %1252 }
 0xa62   :  { %v1255_v55 = vsub.f32 %v1247_v59, %v1253_v0 }
 0xa64   :  { %v1258_v1 = vmul.f32 1.442695, %v1255_v55 }
 0xa65   :  { %v1321_v2 = vpop.permute.xlu1 %1320 }
 0xa66   :  { %1801 = vpow2.f32 %v1258_v1  ;;  %v1326_v57 = vsel %vm419_vm2, %v1321_v2, 0 }
 0xa67   :  { %1712 = vmatpush3.bf16.msra.mxu0 %v1326_v57  ;;  %1803 = vrcp.f32 %v1262_v5 }
 0xa70   :  { %v1802_v4 = vpop.eup %1801 }
 0xa71   :  { %v1263_v48 = vsel %vm391_vm4, %v1802_v4, 0.0  ;;  %v1804_v6 = vpop.eup %1803 }
 0xa72   :  { %1264 = vadd.xlane.f32.xlu0 %v1263_v48  ;;  %v1268_v41 = vmul.f32 %v1804_v6, %v1800_v51 }
 0xa74   :  { %v1270_v12 = vpack.c.bf16 %v1268_v41, %v1268_v41 }
 0xa88   :  { %1272 = vrot.lane.b32.xlu0 %v1982_v39, %s1836_s21 }
 0xaff   :  { %v1265_v7 = vpop.xlane.xlu0 %1264 }
 0xb00   :  { %1805 = vrcp.f32 %v1265_v7 }
 0xb03   :  { %v1273_v10 = vpop.permute.xlu0 %1272 }
 0xb04   :  { %v1278_v11 = vsel %vm419_vm2, %v1273_v10, 0 }
 0xb05   :  { %1706 = vmatpush3.bf16.msra.mxu1 %v1278_v11 }
 0xb06   :  { %1717 = vmatprep.subr.bf16.mxu1 %v1832_v3 }
 0xb08   :  { %1708 = vmatmul.mubr.msk.bf16.vlgmr.msra.gmra.mrb[36].mxu1 %vm391_vm4, %v1270_v12 }
 0xb09   :  { %1721 = vmatprep.mubr.msk.bf16.mxu1 %vm1833_vm0, %v1832_v3  ;;  %1718 = vmatpush3.bf16.msra.mxu1 %v1773_v15 }
 0xb0a   :  { %v1806_v13 = vpop.eup %1805  ;;  %1719 = vmatprep.subr.bf16.mxu1 %v1832_v3  ;;  %v1517_v3 = vld [vmem:[%s2207_s3] ss:$0 sm:$0xff] }
 0xb0b   :  { %v1269_v39 = vmul.f32 %v1806_v13, %v1802_v4 }
 0xb0d   :  { %v1271_v14 = vpack.c.bf16 %v1269_v39, %v1269_v39  ;;  %1720 = vmatpush3.bf16.msra.mxu1 %v1774_v16 }
 0xb0f   :  { %1714 = vmatmul.mubr.msk.bf16.vlgmr.msra.gmra.mrb[40].mxu0 %vm391_vm4, %v1271_v14 }
 0xbdb   :  { %v1314_v17 = vpop.f32.mrb[36].mxu1 }
 0xbdc   :  { %v1709_v18 = vpop.f32.mrb[37].mxu1 }
 0xbdd   :  { %v1317_v19 = vpop.f32.mrb[38].mxu1 }
 0xbde   :  { %v1710_v20 = vpop.f32.mrb[39].mxu1 }
 0xbe2   :  { %v1362_v21 = vpop.f32.mrb[40].mxu0 }
 0xbe3   :  { %v1368_v8 = vpack.c.bf16 %v1362_v21, %v1314_v17  ;;  %v1715_v22 = vpop.f32.mrb[41].mxu0 }
 0xbe4   :  { %v1365_v23 = vpop.f32.mrb[42].mxu0 }
 0xbe5   :  { %v1716_v24 = vpop.f32.mrb[43].mxu0  ;;  %1722 = vmatmul.mubr.msk.bf16.vlgmr.msra.gmra.mrb[40].mxu1 %vm293_vm1, %v1368_v8 }
 0xcb8   :  { %v1422_v25 = vpop.f32.mrb[40].mxu1 }
 0xcb9   :  { %v1429_v26 = vadd.f32 %v1422_v25, %v1142_v54  ;;  %v1723_v27 = vpop.f32.mrb[41].mxu1 }
 0xcba   :  { %v1425_v28 = vpop.f32.mrb[42].mxu1 }
 0xcbb   :  { %v1438_v30 = vadd.f32 %v1517_v3, %v1429_v26  ;;  %v1430_v31 = vadd.f32 %v1425_v28, %v1143_v32  ;;  %v1724_v33 = vpop.f32.mrb[43].mxu1 }
 0xcbd   :  { %1440 = vst [vmem:[#allocation2] sm:$0xff] %v1438_v30  ;;  %v1439_v34 = vadd.f32 %v1517_v3, %v1430_v31 }
 0xcbf   :  { %1441 = vst [vmem:[#allocation2 + $0x8] sm:$0xff] %v1439_v34 }
 0xcc0   :  { %1818 = shalt.err (!%p1815_p4)
}
 0xcc1   :  { %s1819_s9 = scalar_lea.hbm %s2208_s4, 256 }
 0xcc2   :  { %p1820_p5 = scmp.ne.s32.totalorder %s2208_s4, %s1819_s9  ;;  %p1823_p6 = scmp.lt.u32.totalorder %s1819_s9, %s2208_s4 }
 0xcc4   :  { %p1825_p7 = pnand %p1823_p6, %p1820_p5 }
 0xcc6   :  { %1828 = shalt.err (!%p1825_p7)
}
 0xcc7   :  { %s1838_s12 = smov 128   ;;  %s1839_s13 = smov 8  }
 0xcc8   :  { %1453 = dma.vmem_to_hbm [thread:$0]  %s1448_s6, 256, %s2208_s4, [#allocation3], %s1838_s12, %s1838_s12, %s1839_s13  }
 0xcc9   :  { %1829 = dma.done.wait [#allocation3], 256  }
 0xcca   :  { %1830 = vsyncadd [#allocation3], 4294967040 }
 0xccb   :  { %1457 = vsyncpa [#allocation3], 1 }

</bundles_post_ra>
